<compile_context>
chip_gen: v6e
topology: v6e:2x2x1
jax: 0.10.0
libtpu: 0.0.40
codegen_flags: <defaults>
</compile_context>

<pallas_src>
import jax
import jax.numpy as jnp
from jax.experimental import pallas as pl
from jax.experimental.pallas import tpu as pltpu


def _focus_conv_kernel(x_ref, w_ref, b_ref, o_ref):
    # x_ref: (1, K, tn)   space-to-depth activations (channels on sublanes, spatial on lanes)
    # w_ref: (c2, K)      1x1 conv weight with BN scale folded in (bf16)
    # b_ref: (c2, 1)      BN bias (beta - mean * scale), f32
    # o_ref: (1, c2, tn)  lane-dense output tile (NCHW-flattened spatial on lanes)
    acc = jnp.dot(w_ref[...], x_ref[0],
                  preferred_element_type=jnp.float32)        # (c2, tn) on MXU, f32 acc
    y = acc + b_ref[...]                                     # broadcast (c2, 1) bias
    o_ref[0] = jnp.maximum(y, 0.1 * y).astype(o_ref.dtype)   # LeakyReLU(0.1)


def focus_forward(x, conv_w, bn_gamma, bn_beta, bn_mean, bn_var,
                  eps=1e-5, compute_dtype=jnp.bfloat16, max_tile=8192):
    """x: (N, C, H, W) float32 (NCHW).  Returns (N, c2, H//2, W//2) float32."""
    N, C, H, W = x.shape
    c2 = conv_w.shape[0]
    K = 4 * C
    assert conv_w.shape == (c2, K, 1, 1)
    assert H % 2 == 0 and W % 2 == 0
    H2, W2 = H // 2, W // 2
    HW2 = H2 * W2

    # --- glue: space-to-depth, exactly matching the torch.cat slice order.
    # Stays channels-major (NCHW-like) so no NHWC transpose is needed.
    patches = jnp.concatenate(
        [
            x[..., ::2, ::2],
            x[..., 1::2, ::2],
            x[..., ::2, 1::2],
            x[..., 1::2, 1::2],
        ],
        axis=1,
    )  # (N, 4C, H2, W2)
    # Row-major merge of the last two dims is a free reshape: spatial -> lanes.
    xm = patches.reshape(N, K, HW2).astype(compute_dtype)

    # --- fold BN (eval form): scale into the weight, shift into a bias.
    scale = bn_gamma / jnp.sqrt(bn_var + eps)                         # (c2,)
    wm = (conv_w.reshape(c2, K) * scale[:, None]).astype(compute_dtype)
    bias = (bn_beta - bn_mean * scale).reshape(c2, 1).astype(jnp.float32)

    # --- tile selection: big lane-dense spatial tiles, robust to any HW2.
    if HW2 <= max_tile:
        tn = HW2                 # full spatial extent as one block (always legal)
    else:
        tn = max_tile            # multiple of 128 -> unmasked lane-dense stores
    grid = (N, pl.cdiv(HW2, tn))

    out_flat = pl.pallas_call(
        _focus_conv_kernel,
        out_shape=jax.ShapeDtypeStruct((N, c2, HW2), jnp.float32),
        grid_spec=pltpu.PrefetchScalarGridSpec(
            num_scalar_prefetch=0,
            grid=grid,
            in_specs=[
                pl.BlockSpec((1, K, tn), lambda n, j: (n, 0, j)),
                pl.BlockSpec((c2, K), lambda n, j: (0, 0)),
                pl.BlockSpec((c2, 1), lambda n, j: (0, 0)),
            ],
            out_specs=pl.BlockSpec((1, c2, tn), lambda n, j: (n, 0, j)),
        ),
        compiler_params=pltpu.CompilerParams(
            dimension_semantics=("parallel", "parallel"),
        ),
    )(xm, wm, bias)

    # Free row-major split back to NCHW: (N, c2, HW2) -> (N, c2, H2, W2).
    return out_flat.reshape(N, c2, H2, W2)


def focus_reference(x, conv_w, bn_gamma, bn_beta, bn_mean, bn_var, eps=1e-5):
    """Pure-JAX f32 reference matching the PyTorch module (eval mode)."""
    c2 = conv_w.shape[0]
    patches = jnp.concatenate(
        [x[..., ::2, ::2], x[..., 1::2, ::2], x[..., ::2, 1::2], x[..., 1::2, 1::2]],
        axis=1,
    )
    y = jnp.einsum("ok,nkhw->nohw", conv_w.reshape(c2, -1), patches)
    scale = bn_gamma / jnp.sqrt(bn_var + eps)
    y = y * scale[None, :, None, None] + (bn_beta - bn_mean * scale)[None, :, None, None]
    return jnp.where(y > 0, y, 0.1 * y)


if __name__ == "__main__":
    # Focus(c1=4, c2=32, k=1);  input NCHW = (2, 4, 16, 16)
    N, c1, H, W = 2, 4, 16, 16
    c2 = 32

    key = jax.random.PRNGKey(0)
    kx, kw, kg, kb, km, kv = jax.random.split(key, 6)

    x = jax.random.normal(kx, (N, c1, H, W), dtype=jnp.float32)
    conv_w = 0.1 * jax.random.normal(kw, (c2, 4 * c1, 1, 1), dtype=jnp.float32)
    bn_gamma = 1.0 + 0.1 * jax.random.normal(kg, (c2,), dtype=jnp.float32)
    bn_beta = 0.1 * jax.random.normal(kb, (c2,), dtype=jnp.float32)
    bn_mean = 0.1 * jax.random.normal(km, (c2,), dtype=jnp.float32)
    bn_var = jnp.abs(jax.random.normal(kv, (c2,), dtype=jnp.float32)) + 0.5

    out = jax.jit(focus_forward)(x, conv_w, bn_gamma, bn_beta, bn_mean, bn_var)
    out = jax.block_until_ready(out)
    assert out.shape == (N, c2, H // 2, W // 2), out.shape

    ref = focus_reference(x, conv_w, bn_gamma, bn_beta, bn_mean, bn_var)
    # bf16 matmul inputs, f32 accumulation/epilogue -> loose-ish tolerance.
    assert bool(jnp.allclose(out, ref, rtol=5e-2, atol=5e-2)), "mismatch vs f32 reference"
    print("KERNEL_OK")
</pallas_src>

<mosaic_0001>
module attributes {stable_mosaic.version = 11 : i64} {
  func.func @_focus_conv_kernel(%arg0: i32, %arg1: i32, %arg2: memref<1x16x64xbf16, #tpu.memory_space<vmem>>, %arg3: memref<32x16xbf16, #tpu.memory_space<vmem>>, %arg4: memref<32x1xf32, #tpu.memory_space<vmem>>, %arg5: memref<1x32x64xf32, #tpu.memory_space<vmem>>) attributes {dimension_semantics = [#tpu.dimension_semantics<parallel>, #tpu.dimension_semantics<parallel>], iteration_bounds = array<i64: 2, 1>, scalar_prefetch = 0 : i64, scratch_operands = 0 : i64, tpu.core_type = #tpu.core_type<tc>, window_params = [{transform_indices = @transform_0, window_bounds = array<i64: 1, 16, 64>}, {pipeline_mode = #tpu.pipeline_mode<synchronous>, transform_indices = @transform_1, window_bounds = array<i64: 32, 16>}, {pipeline_mode = #tpu.pipeline_mode<synchronous>, transform_indices = @transform_2, window_bounds = array<i64: 32, 1>}, {transform_indices = @transform_3, window_bounds = array<i64: 1, 32, 64>}]} {
    %c0 = arith.constant 0 : index
    %c0_0 = arith.constant 0 : index
    %0 = vector.load %arg3[%c0, %c0_0] : memref<32x16xbf16, #tpu.memory_space<vmem>>, vector<32x16xbf16>
    %c0_1 = arith.constant 0 : index
    %c0_2 = arith.constant 0 : index
    %c0_3 = arith.constant 0 : index
    %1 = vector.load %arg2[%c0_1, %c0_2, %c0_3] : memref<1x16x64xbf16, #tpu.memory_space<vmem>>, vector<1x16x64xbf16>
    %2 = vector.shape_cast %1 : vector<1x16x64xbf16> to vector<16x64xbf16>
    %cst = arith.constant dense<0.000000e+00> : vector<32x64xf32>
    %3 = tpu.matmul %0, %2, %cst {dimension_numbers = #tpu.dot_dimension_numbers<[1], [0], [0], [1], [0, 0, 1, 1], [], []>} : vector<32x16xbf16>, vector<16x64xbf16>, vector<32x64xf32> -> vector<32x64xf32>
    %c0_4 = arith.constant 0 : index
    %c0_5 = arith.constant 0 : index
    %4 = vector.load %arg4[%c0_4, %c0_5] : memref<32x1xf32, #tpu.memory_space<vmem>>, vector<32x1xf32>
    %5 = vector.broadcast %4 : vector<32x1xf32> to vector<32x64xf32>
    %6 = arith.addf %3, %5 : vector<32x64xf32>
    %cst_6 = arith.constant 1.000000e-01 : f32
    %7 = vector.broadcast %cst_6 : f32 to vector<32x64xf32>
    %8 = arith.mulf %7, %6 : vector<32x64xf32>
    %9 = arith.maximumf %6, %8 : vector<32x64xf32>
    %c0_7 = arith.constant 0 : index
    %c0_8 = arith.constant 0 : index
    %c0_9 = arith.constant 0 : index
    %10 = vector.load %arg5[%c0_7, %c0_8, %c0_9] : memref<1x32x64xf32, #tpu.memory_space<vmem>>, vector<1x32x64xf32>
    %11 = vector.shape_cast %10 : vector<1x32x64xf32> to vector<32x64xf32>
    %12 = vector.shape_cast %9 : vector<32x64xf32> to vector<1x32x64xf32>
    tpu.vector_store %arg5[%c0_7, %c0_8, %c0_9], %12 {strides = array<i32>} : memref<1x32x64xf32, #tpu.memory_space<vmem>>, vector<1x32x64xf32>,
    return
  }
  func.func @transform_0(%arg0: i32, %arg1: i32) -> (i32, i32, i32) {
    %c0_i32 = arith.constant 0 : i32
    %c0_i32_0 = arith.constant 0 : i32
    return %arg0, %c0_i32, %arg1 : i32, i32, i32
  }
  func.func @transform_1(%arg0: i32, %arg1: i32) -> (i32, i32) {
    %c0_i32 = arith.constant 0 : i32
    %c0_i32_0 = arith.constant 0 : i32
    %c0_i32_1 = arith.constant 0 : i32
    return %c0_i32, %c0_i32_0 : i32, i32
  }
  func.func @transform_2(%arg0: i32, %arg1: i32) -> (i32, i32) {
    %c0_i32 = arith.constant 0 : i32
    %c0_i32_0 = arith.constant 0 : i32
    %c0_i32_1 = arith.constant 0 : i32
    return %c0_i32, %c0_i32_0 : i32, i32
  }
  func.func @transform_3(%arg0: i32, %arg1: i32) -> (i32, i32, i32) {
    %c0_i32 = arith.constant 0 : i32
    %c0_i32_0 = arith.constant 0 : i32
    return %arg0, %c0_i32, %arg1 : i32, i32, i32
  }
}

</mosaic_0001>

<bundles_post_ra>
// kernel: focus_forward.1
= control target key start
LH: loop header
LB: loop body
LE: loop exit
PB: predicated region body
PF: predicated region fallthrough
CT: control target
= control target key end

     0   :  { %s503_s12 = smov 0   ;;  %s505_s13 = smov 0   ;;  %s564_s0 = inlined_call_operand.vmem [shape: bf16[2,16,64], index: 0, kind: input, shape index: {}]   ;;  %s565_s1 = inlined_call_operand.vmem [shape: bf16[32,16], index: 1, kind: input, shape index: {}]   ;;  %s566_s2 = inlined_call_operand.vmem [shape: f32[32,1], index: 2, kind: input, shape index: {}]   ;;  %s567_s3 = inlined_call_operand.vmem [shape: f32[2,32,64], index: 3, kind: output, shape index: {}]  }
   0x1   :  { %s507_s14 = smov 0  }
   0x2 LB: > { %s25_s15 = sadd.s32 1, %s476_s13  ;;  %p405_p0 = scmp.ge.s32.totalorder %s480_s14, 1  ;;  %s480_s14 = sphi %s507_s14, %s13_s14   ;;  %s476_s13 = sphi %s505_s13, %s569_s13   ;;  %s472_s12 = sphi %s503_s12, %s568_s12  }
   0x3   : > { %p27_p1 = scmp.ge.s32.totalorder %s25_s15, 2  ;;  %p156_p2 = scmp.lt.s32.totalorder %s480_s14, 3 }
   0x5   : > { %s571_s15 = smov (%p27_p1, %s25_s15), 0  ;;  %p157_p3 = pnand %p405_p0, %p156_p2 }
   0x6   : > { %p186_p4 = scmp.lt.s32.totalorder (!%p157_p3), %s472_s12, 1 }
   0x7   : > { %160 = sbr.rel (%p157_p3) target bundleno = 226 (0xe2), region = 32 }
   0xc   : > { %v456_v0 = vld [vmem:[%s565_s1] sm:$0xff]   ;;  %vm249_vm0 = vcmask 130048   ;;  %s573_s12 = smov (!%p186_p4, %s472_s12), 1  ;;  %v211_v1 = vld [vmem:[%s566_s2 + $0x10] sm:$0xff]  ;;  %v482_v3 = vmov 0   ;;  %v212_v4 = vld [vmem:[%s566_s2 + $0x18] sm:$0xff] }
   0xd   : > { %424 = vmatprep.mubr.msk.bf16.mxu0 %vm249_vm0, %v456_v0  ;;  %v209_v2 = vld [vmem:[%s566_s2] sm:$0xff]  ;;  %454 = vset.pattern.permute.xlu1 %v482_v3  ;;  %s417_s22 = sshll.u32 %s573_s12, 3  ;;  %v210_v5 = vld [vmem:[%s566_s2 + $0x8] sm:$0xff]  ;;  %s418_s5 = sshll.u32 %s573_s12, 5  ;;  %vm313_vm1 = vcmask 523264  }
   0xe   : > { %453 = vset.pattern.permute.xlu0 %v482_v3  ;;  %225 = vperm.xlu1 %454, %v211_v1   ;;  %s193_s25 = scalar_lea.vmem %s564_s0, %s417_s22  ;;  %v457_v7 = vld [vmem:[%s565_s1 + $0x8] sm:$0xff]   ;;  %s201_s8 = scalar_lea.vmem %s567_s3, %s418_s5 }
   0xf   : > { %215 = vperm.xlu0 %453, %v209_v2   ;;  %v455_v6 = vld [vmem:[%s193_s25] sm:$0xff]  }
  0x10   : > { %422 = vmatprep.subr.bf16.mxu0 %v455_v6 }
  0x11   : > { %423 = vmatpush3.bf16.msra.mxu0 %v455_v6 }
  0x12   : > { %230 = vperm.xlu1 %454, %v212_v4  }
  0x13   : > { %220 = vperm.xlu0 %453, %v210_v5  }
  0x14   : > { %425 = vmatmul.mubr.msk.bf16.vlgmr.msra.gmra.mxu0 %vm249_vm0, %v457_v7 }
  0x89   : > { %v226_v8 = vpop.permute.xlu1 %225 }
  0x8a   : > { %v216_v9 = vpop.permute.xlu0 %215 }
  0x8d   : > { %v231_v15 = vpop.permute.xlu1 %230 }
  0x8e   : > { %v221_v20 = vpop.permute.xlu0 %220 }
  0xd4   : > { %v426_v10 = vpop.f32.mrf.mxu0 }
  0xd5   : > { %v299_v11 = vadd.f32 %v426_v10, %v226_v8 }
  0xd6   : > { %v290_v12 = vpop.f32.mrf.mxu0 }
  0xd7   : > { %v307_v13 = vmul.f32 0.1, %v299_v11  ;;  %v291_v14 = vadd.f32 %v290_v12, %v216_v9 }
  0xd8   : > { %v427_v16 = vpop.f32.mrf.mxu0 }
  0xd9   : > { %v311_v17 = vmax.f32 %v299_v11, %v307_v13  ;;  %v305_v18 = vmul.f32 0.1, %v291_v14  ;;  %v302_v19 = vadd.f32 %v427_v16, %v231_v15 }
  0xda   : > { %v293_v21 = vpop.f32.mrf.mxu0 }
  0xdb   : > { %316 = vst.msk [vmem:[%s201_s8 + $0x10] sm:$0xff] %vm313_vm1, %v311_v17  ;;  %v309_v22 = vmax.f32 %v291_v14, %v305_v18  ;;  %v308_v23 = vmul.f32 0.1, %v302_v19  ;;  %v294_v24 = vadd.f32 %v293_v21, %v221_v20 }
  0xdd   : > { %314 = vst.msk [vmem:[%s201_s8] sm:$0xff] %vm313_vm1, %v309_v22  ;;  %v312_v25 = vmax.f32 %v302_v19, %v308_v23  ;;  %v306_v26 = vmul.f32 0.1, %v294_v24 }
  0xdf   : > { %317 = vst.msk [vmem:[%s201_s8 + $0x18] sm:$0xff] %vm313_vm1, %v312_v25  ;;  %v310_v27 = vmax.f32 %v294_v24, %v306_v26 }
  0xe1   : > { %315 = vst.msk [vmem:[%s201_s8 + $0x8] sm:$0xff] %vm313_vm1, %v310_v27 }
  0xe2 PF: > { %s13_s14 = sadd.s32 1, %s480_s14   ;;  %s568_s12 = smov %s476_s13 }
  0xe3   : > { %p10_p5 = scmp.ge.s32.totalorder %s13_s14, 4   ;;  %s569_s13 = smov %s571_s15 }
  0xe5   :  { %12 = sbr.rel (!%p10_p5) target bundleno = 2 (0x2), region = 62 }

</bundles_post_ra>
